<compile_context>
chip_gen: v7x
topology: tpu7x:2x2x1
jax: 0.10.0
libtpu: 0.0.40
codegen_flags: <defaults>
</compile_context>

<pallas_src>
import jax
import jax.numpy as jnp
from jax.experimental import pallas as pl
from jax.experimental.pallas import tpu as pltpu


_LANE = 128
# Target ~4 MiB per VMEM buffer per grid step (input + output, each double
# buffered -> ~16 MiB in flight).  Fits v5e/v6e (128 MiB VMEM) and v7x
# (64 MiB per TC) with the explicit 32 MiB scoped limit below.
_TARGET_TILE_BYTES = 4 << 20
# Below this many (rows, 128) rows, a single full-extent block is cheaper
# than splitting (grid-step overhead dominates for tiny tensors).
_SINGLE_BLOCK_MAX_ROWS = 1024
_VMEM_LIMIT_BYTES = 32 << 20


def _copy_kernel(x_ref, o_ref):
    # Pure pass-through on one lane-dense tile: o = x.
    # Concrete _forward kernels replace this body with real elementwise work.
    o_ref[...] = x_ref[...]


def _choose_block_rows(rows: int, itemsize: int) -> int:
    """Pick a lane-dense block height.

    - tiny tensors: one full-extent block (always a legal block shape),
    - otherwise: a multiple of 32 rows (respects f32/bf16/int8 packing),
      capped at ~4 MiB of bytes per buffer and at ~rows/2 so the grid has
      >= 2 steps (lets v7x's two TensorCores both drive HBM).
    """
    if rows <= _SINGLE_BLOCK_MAX_ROWS:
        return rows
    target = _TARGET_TILE_BYTES // (_LANE * itemsize)
    target = max((target // 32) * 32, 32)
    half = -(-rows // 2)                    # ceil(rows / 2)
    half = ((half + 31) // 32) * 32         # round up to a multiple of 32
    return max(min(target, half), 32)


def _pallas_identity(x: jax.Array) -> jax.Array:
    """Lane-dense, tiled, parallel copy (scaffolding for concrete _forward kernels).

    NOTE: for a *literal* identity, returning `x` directly would be optimal;
    the kernel is kept to exercise the streaming scaffolding a real _forward
    implementation would reuse.
    """
    orig_shape = x.shape
    total = x.size
    if total == 0:
        return x

    itemsize = jnp.dtype(x.dtype).itemsize

    # Flatten; pad the tail up to a multiple of the 128-wide lane so every
    # store is a full unmasked vst and VMEM stays bounded for any shape.
    flat = x.reshape(total)
    padded = total
    if total % _LANE != 0:
        padded = ((total + _LANE - 1) // _LANE) * _LANE
        flat = jnp.pad(flat, (0, padded - total))

    rows = padded // _LANE
    x2 = flat.reshape(rows, _LANE)          # lane-dense: last dim exactly 128

    block_rows = _choose_block_rows(rows, itemsize)
    grid = (pl.cdiv(rows, block_rows),)     # Pallas masks any ragged tail block

    out2 = pl.pallas_call(
        _copy_kernel,
        out_shape=jax.ShapeDtypeStruct((rows, _LANE), x.dtype),
        grid=grid,
        in_specs=[pl.BlockSpec((block_rows, _LANE), lambda i: (i, 0))],
        out_specs=pl.BlockSpec((block_rows, _LANE), lambda i: (i, 0)),
        # Output reuses the input HBM buffer (elementwise / in-place friendly).
        input_output_aliases={0: 0},
        compiler_params=pltpu.CompilerParams(
            dimension_semantics=("parallel",),
            vmem_limit_bytes=_VMEM_LIMIT_BYTES),
        # Pure memory-bound copy: tell XLA so it can overlap with neighbors.
        cost_estimate=pl.CostEstimate(
            flops=0, transcendentals=0,
            bytes_accessed=2 * padded * itemsize),
    )(x2)

    out_flat = out2.reshape(padded)
    if padded != total:
        out_flat = out_flat[:total]
    return out_flat.reshape(orig_shape)


class Module:
    """JAX/Pallas port of the abstract gating Module."""

    def __init__(self, logger=None, sizes=None, modes=None, **kwargs):
        # check_leftargs: reject unexpected kwargs (mirrors the PyTorch helper).
        if kwargs:
            raise ValueError(f"Unexpected kwargs: {list(kwargs)}")
        self.modes = modes

    def forward(self, batch, mode):
        if self.modes is not None and mode not in self.modes:
            # PyTorch: `return batch` -- zero-cost pass-through, no device work.
            return batch
        return self._forward(batch, mode)

    def _forward(self, batch, mode):
        # TODO(synk): abstract in the source module (raises NotImplementedError);
        # concrete subclasses supply the real compute kernel here.
        raise NotImplementedError

    __call__ = forward


class IdentityModule(Module):
    """Concrete subclass demonstrating the tiled lane-dense Pallas scaffolding."""

    def _forward(self, batch, mode):
        # A production identity would simply `return batch`; the kernel call is
        # kept here to exercise the streaming scaffolding real kernels reuse.
        return _pallas_identity(batch)


if __name__ == "__main__":
    key = jax.random.PRNGKey(0)
    # Small NCHW batch tensor consistent with an image-pipeline module.
    x = jax.random.normal(key, (2, 4, 16, 16), dtype=jnp.float32)

    # 1) Base module with a mode gate: mode not in modes -> pure pass-through
    #    (returns `batch` itself, no kernel launched -- matches PyTorch exactly).
    base = Module(logger=None, sizes=None, modes=["train"])
    out_pass = base(x, mode="eval")
    assert out_pass is x

    # 2) Concrete subclass: _forward runs the lane-dense, tiled Pallas kernel.
    mod = IdentityModule(logger=None, sizes=None, modes=None)  # always _forward
    out = mod(x, mode="eval")
    out = jax.block_until_ready(out)
    assert out.shape == x.shape and out.dtype == x.dtype
    assert bool(jnp.all(out == x))

    # 3) Ragged shape (size not a multiple of 128) exercises the pad+slice path.
    x_ragged = jax.random.normal(jax.random.PRNGKey(1), (3, 5, 7), dtype=jnp.float32)
    out_ragged = jax.block_until_ready(mod(x_ragged, mode="eval"))
    assert out_ragged.shape == x_ragged.shape
    assert bool(jnp.all(out_ragged == x_ragged))

    print("KERNEL_OK")
</pallas_src>

<mosaic_0001>
module attributes {stable_mosaic.version = 11 : i64} {
  func.func @_copy_kernel(%arg0: i32, %arg1: memref<16x128xf32, #tpu.memory_space<vmem>>, %arg2: memref<16x128xf32, #tpu.memory_space<vmem>>) attributes {dimension_semantics = [#tpu.dimension_semantics<parallel>], iteration_bounds = array<i64: 1>, scalar_prefetch = 0 : i64, scratch_operands = 0 : i64, tpu.core_type = #tpu.core_type<tc>, window_params = [{transform_indices = @transform_0, window_bounds = array<i64: 16, 128>}, {transform_indices = @transform_1, window_bounds = array<i64: 16, 128>}]} {
    %c0 = arith.constant 0 : index
    %c0_0 = arith.constant 0 : index
    %0 = vector.load %arg1[%c0, %c0_0] : memref<16x128xf32, #tpu.memory_space<vmem>>, vector<16x128xf32>
    %c0_1 = arith.constant 0 : index
    %c0_2 = arith.constant 0 : index
    %1 = vector.load %arg2[%c0_1, %c0_2] : memref<16x128xf32, #tpu.memory_space<vmem>>, vector<16x128xf32>
    tpu.vector_store %arg2[%c0_1, %c0_2], %0 {strides = array<i32>} : memref<16x128xf32, #tpu.memory_space<vmem>>, vector<16x128xf32>,
    return
  }
  func.func @transform_0(%arg0: i32) -> (i32, i32) {
    %c0_i32 = arith.constant 0 : i32
    %c0_i32_0 = arith.constant 0 : i32
    return %arg0, %c0_i32 : i32, i32
  }
  func.func @transform_1(%arg0: i32) -> (i32, i32) {
    %c0_i32 = arith.constant 0 : i32
    %c0_i32_0 = arith.constant 0 : i32
    return %arg0, %c0_i32 : i32, i32
  }
}

</mosaic_0001>

<bundles_post_ra>
// kernel: tpu_custom_call.1
= control target key start
LH: loop header
LB: loop body
LE: loop exit
PB: predicated region body
PF: predicated region fallthrough
CT: control target
= control target key end

     0   :  { %6 = vsyncpa [#allocation3], 0  ;;  %s134_s0 = inlined_call_operand.hbm [shape: f32[16,128], index: 0, kind: input, shape index: {}, may-alias: {0,1}]   ;;  %s135_s1 = inlined_call_operand.hbm [shape: f32[16,128], index: 1, kind: output, shape index: {}, may-alias: {0,1}]  }
   0x1   :  { %7 = vsyncpa [#allocation4], 0  ;;  %s96_s6 = smov [#allocation2]   ;;  %s48_s10 = scalar_lea.hbm %s134_s0, 256 }
   0x2   :  { %s13_s7 = sshll.u32 %s96_s6, 4  ;;  %p49_p0 = scmp.ne.s32.totalorder %s134_s0, %s48_s10  ;;  %s14_s7 = int_to_ptr.vmem [resolvable:$true] %s13_s7 }
   0x3   :  { %p52_p1 = scmp.lt.u32.totalorder %s48_s10, %s134_s0 }
   0x5   :  { %p54_p2 = pnand %p52_p1, %p49_p0 }
   0x7   :  { %57 = shalt.err (!%p54_p2)
}
   0x8   :  { %s58_s15 = scalar_lea.vmem %s14_s7, 256  ;;  %p63_p4 = scmp.lt.s32.totalorder %s14_s7, %s14_s7 }
   0x9   :  { %p59_p3 = scmp.ne.s32.totalorder %s14_s7, %s58_s15  ;;  %p64_p5 = scmp.lt.s32.totalorder %s58_s15, %s58_s15 }
   0xb   :  { %p65_p6 = por %p64_p5, %p63_p4 }
   0xd   :  { %p66_p7 = pnand %p65_p6, %p59_p3 }
   0xf   :  { %69 = shalt.err (!%p66_p7)
}
  0x10   :  { %s97_s16 = smov 128   ;;  %s98_s17 = smov 8  }
  0x11   :  { %19 = dma.hbm_to_vmem [thread:$0]  %s134_s0, 256, %s14_s7, [#allocation3], %s97_s16, %s97_s16, %s98_s17  }
  0x12   :  { %92 = dma.done.wait [#allocation3], 256  }
  0x13   :  { %93 = vsyncadd [#allocation3], 4294967040  ;;  %s99_s20 = smov [#allocation5]   ;;  %v23_v0 = vld [vmem:[#allocation2] sm:$0xff]  ;;  %v24_v1 = vld [vmem:[#allocation2 + $0x8] sm:$0xff] }
  0x14   :  { %s32_s21 = sshll.u32 %s99_s20, 4  ;;  %25 = vst [vmem:[#allocation5] sm:$0xff] %v23_v0  ;;  %26 = vst [vmem:[#allocation5 + $0x8] sm:$0xff] %v24_v1  ;;  %s33_s21 = int_to_ptr.vmem [resolvable:$true] %s32_s21 }
  0x15   :  { %s70_s22 = scalar_lea.vmem %s33_s21, 256  ;;  %p75_p9 = scmp.lt.s32.totalorder %s33_s21, %s33_s21 }
  0x16   :  { %p71_p8 = scmp.ne.s32.totalorder %s33_s21, %s70_s22  ;;  %p76_p10 = scmp.lt.s32.totalorder %s70_s22, %s70_s22 }
  0x18   :  { %p77_p11 = por %p76_p10, %p75_p9 }
  0x1a   :  { %p78_p12 = pnand %p77_p11, %p71_p8 }
  0x1c   :  { %81 = shalt.err (!%p78_p12)
}
  0x1d   :  { %s82_s0 = scalar_lea.hbm %s135_s1, 256 }
  0x1e   :  { %p83_p13 = scmp.ne.s32.totalorder %s135_s1, %s82_s0  ;;  %p86_p0 = scmp.lt.u32.totalorder %s82_s0, %s135_s1 }
  0x20   :  { %p88_p1 = pnand %p86_p0, %p83_p13 }
  0x22   :  { %91 = shalt.err (!%p88_p1)
}
  0x23   :  { %38 = dma.vmem_to_hbm [thread:$0]  %s33_s21, 256, %s135_s1, [#allocation4], %s97_s16, %s97_s16, %s98_s17  }
  0x24   :  { %94 = dma.done.wait [#allocation4], 256  }
  0x25   :  { %95 = vsyncadd [#allocation4], 4294967040 }
  0x26   :  { %42 = vsyncpa [#allocation3], 1 }
  0x27   :  { %43 = vsyncpa [#allocation4], 1 }

</bundles_post_ra>
